<compile_context>
chip_gen: v7x
topology: tpu7x:2x2x1
jax: 0.10.0
libtpu: 0.0.40
codegen_flags: <defaults>
</compile_context>

<pallas_src>
import functools

import jax
import jax.numpy as jnp
from jax import lax
from jax.experimental import pallas as pl
from jax.experimental.pallas import tpu as pltpu

_CLASS_PAD = 128  # pad FC output to a full lane block (unmasked store)


def _round_up(x: int, m: int) -> int:
    return (x + m - 1) // m * m


def _textcnn_kernel(x_ref, w3_ref, bconv_ref, fcw_ref, fcb_ref, out_ref):
    """One batch tile: Conv1d(k=3, pad=1) + bias + ReLU + MaxPool1d(T) + FC."""
    tb, tp2, e = x_ref.shape            # (batch_tile, T+2, E), bf16
    t = tp2 - 2
    h = w3_ref.shape[2]

    # Conv1d(kernel=3, padding=1) as three shifted (tb*T, E) @ (E, H) MXU dots,
    # accumulated in f32; bias broadcast once per tile.
    conv = bconv_ref[...]                                      # (1, H) f32
    for k in range(3):
        xk = x_ref[:, k:k + t, :].reshape(tb * t, e)           # shifted slice, bf16
        conv = conv + jnp.dot(xk, w3_ref[k],
                              preferred_element_type=jnp.float32)
    act = jnp.maximum(conv, 0.0).reshape(tb, t, h)             # ReLU, f32
    pooled = jnp.max(act, axis=1)                              # MaxPool1d(T) -> (tb, H)
    # TODO(synk): F.dropout(x, p) defaults to training=True in the reference;
    # treated as identity here (p=0 / eval mode).
    out_ref[...] = (jnp.dot(pooled, fcw_ref[...],
                            preferred_element_type=jnp.float32)
                    + fcb_ref[...])                            # (tb, 128) f32


@functools.partial(jax.jit, static_argnames=("max_length", "batch_tile"))
def textcnn_forward(token_ids, params, *, max_length, batch_tile=256):
    B, T = token_ids.shape
    assert T == max_length, "MaxPool1d(max_length) assumes seq_len == max_length"
    E = params["embedding"].shape[1]
    H = params["conv_b"].shape[0]
    C = params["fc_b"].shape[0]
    assert _CLASS_PAD >= C

    # Batch tile: multiple of 16 (M = bt*T hits full MXU row groups on v6e/v7x),
    # clamped for small batches (still a multiple of 8 sublanes).
    bt = max(16, min(_round_up(batch_tile, 16), _round_up(B, 16)))
    n_tiles = pl.cdiv(B, bt)
    B_pad = n_tiles * bt

    # Embedding gather (bf16 stream) + Conv1d padding=1 as one zero time-step on
    # each side.  No im2col: the kernel builds the 3 shifts from this slab.
    emb = jnp.take(params["embedding"].astype(jnp.bfloat16), token_ids, axis=0)
    x = jnp.pad(emb, ((0, B_pad - B), (1, 1), (0, 0)))          # (B_pad, T+2, E)

    # Conv weight (H, E, 3) -> (3, E, H) right-multiply slabs, bf16.
    w3 = jnp.transpose(params["conv_w"], (2, 1, 0)).astype(jnp.bfloat16)
    b_conv = params["conv_b"].reshape(1, H).astype(jnp.float32)

    # FC in PyTorch nn.Linear layout (C, H): transpose + pad to 128 output lanes.
    fc_w = jnp.pad(params["fc_w"].T.astype(jnp.float32),
                   ((0, 0), (0, _CLASS_PAD - C)))               # (H, 128)
    fc_b = jnp.pad(params["fc_b"].reshape(1, C).astype(jnp.float32),
                   ((0, 0), (0, _CLASS_PAD - C)))               # (1, 128)

    # Scoped-VMEM budget: double-buffered tiles + f32 intermediates, 2x headroom;
    # >= v5e's 16 MiB scoped default, <= v7x's 64 MiB physical VMEM.
    tile_bytes = (2 * bt * (T + 2) * E * 2                      # x, bf16, 2 bufs
                  + 2 * bt * _CLASS_PAD * 4                     # out, f32, 2 bufs
                  + 2 * (3 * E * H * 2 + H * 4 + H * _CLASS_PAD * 4 + _CLASS_PAD * 4)
                  + 4 * bt * T * H * 4)                         # f32 conv/act temps
    vmem_limit = int(min(max(2 * tile_bytes, 32 * 1024 * 1024), 64 * 1024 * 1024))

    out = pl.pallas_call(
        _textcnn_kernel,
        out_shape=jax.ShapeDtypeStruct((B_pad, _CLASS_PAD), jnp.float32),
        grid=(n_tiles,),
        in_specs=[
            pl.BlockSpec((bt, T + 2, E), lambda i: (i, 0, 0)),
            pl.BlockSpec((3, E, H), lambda i: (0, 0, 0)),
            pl.BlockSpec((1, H), lambda i: (0, 0)),
            pl.BlockSpec((H, _CLASS_PAD), lambda i: (0, 0)),
            pl.BlockSpec((1, _CLASS_PAD), lambda i: (0, 0)),
        ],
        out_specs=pl.BlockSpec((bt, _CLASS_PAD), lambda i: (i, 0)),
        compiler_params=pltpu.CompilerParams(
            dimension_semantics=("parallel",),
            vmem_limit_bytes=vmem_limit),
    )(x, w3, b_conv, fc_w, fc_b)
    return out[:B, :C]


def _reference(token_ids, params, *, max_length):
    """Pure-JAX f32 mirror of the PyTorch forward (for self-check)."""
    hp = lax.Precision.HIGHEST
    emb = jnp.take(params["embedding"].astype(jnp.float32), token_ids, axis=0)
    x = jnp.transpose(emb, (0, 2, 1))                                  # (B, E, T)
    conv = lax.conv_general_dilated(
        x, params["conv_w"].astype(jnp.float32), window_strides=(1,),
        padding=((1, 1),), dimension_numbers=("NCH", "OIH", "NCH"), precision=hp)
    conv = conv + params["conv_b"][None, :, None]
    act = jnp.maximum(conv, 0.0)
    pooled = jnp.max(act[:, :, :max_length], axis=2)                   # MaxPool1d
    return jnp.dot(pooled, params["fc_w"].T, precision=hp) + params["fc_b"][None, :]


if __name__ == "__main__":
    # args: vocab_size=50, embedding_dim=32, hidden_dim=32, num_class=4,
    # max_length=16, dropout=0.0.  Input: token ids (batch=2, seq=max_length).
    vocab_size, emb_dim, hidden_dim, num_class, max_length = 50, 32, 32, 4, 16
    batch = 2

    key = jax.random.PRNGKey(0)
    ks = jax.random.split(key, 6)

    def init(k, shape, scale=0.1):
        return (scale * jax.random.normal(k, shape)).astype(jnp.float32)

    params = {
        "embedding": init(ks[0], (vocab_size, emb_dim)),
        "conv_w": init(ks[1], (hidden_dim, emb_dim, 3)),   # PyTorch Conv1d (O, I, K)
        "conv_b": init(ks[2], (hidden_dim,)),
        "fc_w": init(ks[3], (num_class, hidden_dim)),      # PyTorch Linear (out, in)
        "fc_b": init(ks[4], (num_class,)),
    }
    tokens = jax.random.randint(ks[5], (batch, max_length), 0, vocab_size,
                                dtype=jnp.int32)

    out = textcnn_forward(tokens, params, max_length=max_length)
    out = jax.block_until_ready(out)

    ref = _reference(tokens, params, max_length=max_length)
    assert out.shape == (batch, num_class), out.shape
    # bf16 activation/weight streaming in the kernel -> small deviation from the
    # f32 reference at these (~0.1) magnitudes.
    assert jnp.allclose(out, ref, atol=3e-3, rtol=3e-2), (out, ref)
    print("KERNEL_OK")
</pallas_src>

<mosaic_0001>
module attributes {stable_mosaic.version = 11 : i64} {
  func.func @_textcnn_kernel(%arg0: i32, %arg1: memref<16x18x32xbf16, #tpu.memory_space<vmem>>, %arg2: memref<3x32x32xbf16, #tpu.memory_space<vmem>>, %arg3: memref<1x32xf32, #tpu.memory_space<vmem>>, %arg4: memref<32x128xf32, #tpu.memory_space<vmem>>, %arg5: memref<1x128xf32, #tpu.memory_space<vmem>>, %arg6: memref<16x128xf32, #tpu.memory_space<vmem>>) attributes {dimension_semantics = [#tpu.dimension_semantics<parallel>], iteration_bounds = array<i64: 1>, scalar_prefetch = 0 : i64, scratch_operands = 0 : i64, tpu.core_type = #tpu.core_type<tc>, window_params = [{transform_indices = @transform_0, window_bounds = array<i64: 16, 18, 32>}, {pipeline_mode = #tpu.pipeline_mode<synchronous>, transform_indices = @transform_1, window_bounds = array<i64: 3, 32, 32>}, {pipeline_mode = #tpu.pipeline_mode<synchronous>, transform_indices = @transform_2, window_bounds = array<i64: 1, 32>}, {pipeline_mode = #tpu.pipeline_mode<synchronous>, transform_indices = @transform_3, window_bounds = array<i64: 32, 128>}, {pipeline_mode = #tpu.pipeline_mode<synchronous>, transform_indices = @transform_4, window_bounds = array<i64: 1, 128>}, {transform_indices = @transform_5, window_bounds = array<i64: 16, 128>}]} {
    %c0 = arith.constant 0 : index
    %c0_0 = arith.constant 0 : index
    %0 = vector.load %arg3[%c0, %c0_0] : memref<1x32xf32, #tpu.memory_space<vmem>>, vector<1x32xf32>
    %c0_1 = arith.constant 0 : index
    %c0_2 = arith.constant 0 : index
    %c0_3 = arith.constant 0 : index
    %1 = vector.load %arg1[%c0_1, %c0_2, %c0_3] : memref<16x18x32xbf16, #tpu.memory_space<vmem>>, vector<16x16x32xbf16>
    %2 = vector.shape_cast %1 : vector<16x16x32xbf16> to vector<256x32xbf16>
    %c0_4 = arith.constant 0 : index
    %c0_5 = arith.constant 0 : index
    %c0_6 = arith.constant 0 : index
    %3 = vector.load %arg2[%c0_4, %c0_5, %c0_6] : memref<3x32x32xbf16, #tpu.memory_space<vmem>>, vector<1x32x32xbf16>
    %4 = vector.shape_cast %3 : vector<1x32x32xbf16> to vector<32x32xbf16>
    %cst = arith.constant dense<0.000000e+00> : vector<256x32xf32>
    %5 = tpu.matmul %2, %4, %cst {dimension_numbers = #tpu.dot_dimension_numbers<[1], [0], [0], [1], [0, 0, 1, 1], [], []>} : vector<256x32xbf16>, vector<32x32xbf16>, vector<256x32xf32> -> vector<256x32xf32>
    %6 = vector.broadcast %0 : vector<1x32xf32> to vector<256x32xf32>
    %7 = arith.addf %6, %5 : vector<256x32xf32>
    %c0_7 = arith.constant 0 : index
    %c1 = arith.constant 1 : index
    %c0_8 = arith.constant 0 : index
    %8 = vector.load %arg1[%c0_7, %c1, %c0_8] : memref<16x18x32xbf16, #tpu.memory_space<vmem>>, vector<16x16x32xbf16>
    %9 = vector.shape_cast %8 : vector<16x16x32xbf16> to vector<256x32xbf16>
    %c1_9 = arith.constant 1 : index
    %c0_10 = arith.constant 0 : index
    %c0_11 = arith.constant 0 : index
    %10 = vector.load %arg2[%c1_9, %c0_10, %c0_11] : memref<3x32x32xbf16, #tpu.memory_space<vmem>>, vector<1x32x32xbf16>
    %11 = vector.shape_cast %10 : vector<1x32x32xbf16> to vector<32x32xbf16>
    %cst_12 = arith.constant dense<0.000000e+00> : vector<256x32xf32>
    %12 = tpu.matmul %9, %11, %cst_12 {dimension_numbers = #tpu.dot_dimension_numbers<[1], [0], [0], [1], [0, 0, 1, 1], [], []>} : vector<256x32xbf16>, vector<32x32xbf16>, vector<256x32xf32> -> vector<256x32xf32>
    %13 = arith.addf %7, %12 : vector<256x32xf32>
    %c0_13 = arith.constant 0 : index
    %c2 = arith.constant 2 : index
    %c0_14 = arith.constant 0 : index
    %14 = vector.load %arg1[%c0_13, %c2, %c0_14] : memref<16x18x32xbf16, #tpu.memory_space<vmem>>, vector<16x16x32xbf16>
    %15 = vector.shape_cast %14 : vector<16x16x32xbf16> to vector<256x32xbf16>
    %c2_15 = arith.constant 2 : index
    %c0_16 = arith.constant 0 : index
    %c0_17 = arith.constant 0 : index
    %16 = vector.load %arg2[%c2_15, %c0_16, %c0_17] : memref<3x32x32xbf16, #tpu.memory_space<vmem>>, vector<1x32x32xbf16>
    %17 = vector.shape_cast %16 : vector<1x32x32xbf16> to vector<32x32xbf16>
    %cst_18 = arith.constant dense<0.000000e+00> : vector<256x32xf32>
    %18 = tpu.matmul %15, %17, %cst_18 {dimension_numbers = #tpu.dot_dimension_numbers<[1], [0], [0], [1], [0, 0, 1, 1], [], []>} : vector<256x32xbf16>, vector<32x32xbf16>, vector<256x32xf32> -> vector<256x32xf32>
    %19 = arith.addf %13, %18 : vector<256x32xf32>
    %cst_19 = arith.constant 0.000000e+00 : f32
    %20 = vector.broadcast %cst_19 : f32 to vector<256x32xf32>
    %21 = arith.maximumf %19, %20 : vector<256x32xf32>
    %22 = vector.shape_cast %21 : vector<256x32xf32> to vector<16x16x32xf32>
    %cst_20 = arith.constant dense<0xFF800000> : vector<16x32xf32>
    %23 = vector.multi_reduction <maximumf>, %22, %cst_20 [1] : vector<16x16x32xf32> to vector<16x32xf32>
    %c0_21 = arith.constant 0 : index
    %c0_22 = arith.constant 0 : index
    %24 = vector.load %arg4[%c0_21, %c0_22] : memref<32x128xf32, #tpu.memory_space<vmem>>, vector<32x128xf32>
    %cst_23 = arith.constant dense<0.000000e+00> : vector<16x128xf32>
    %25 = tpu.matmul %23, %24, %cst_23 {dimension_numbers = #tpu.dot_dimension_numbers<[1], [0], [0], [1], [0, 0, 1, 1], [], []>} : vector<16x32xf32>, vector<32x128xf32>, vector<16x128xf32> -> vector<16x128xf32>
    %c0_24 = arith.constant 0 : index
    %c0_25 = arith.constant 0 : index
    %26 = vector.load %arg5[%c0_24, %c0_25] : memref<1x128xf32, #tpu.memory_space<vmem>>, vector<1x128xf32>
    %27 = vector.broadcast %26 : vector<1x128xf32> to vector<16x128xf32>
    %28 = arith.addf %25, %27 : vector<16x128xf32>
    %c0_26 = arith.constant 0 : index
    %c0_27 = arith.constant 0 : index
    %29 = vector.load %arg6[%c0_26, %c0_27] : memref<16x128xf32, #tpu.memory_space<vmem>>, vector<16x128xf32>
    tpu.vector_store %arg6[%c0_26, %c0_27], %28 {strides = array<i32>} : memref<16x128xf32, #tpu.memory_space<vmem>>, vector<16x128xf32>,
    return
  }
  func.func @transform_0(%arg0: i32) -> (i32, i32, i32) {
    %c0_i32 = arith.constant 0 : i32
    %c0_i32_0 = arith.constant 0 : i32
    %c0_i32_1 = arith.constant 0 : i32
    return %arg0, %c0_i32, %c0_i32_0 : i32, i32, i32
  }
  func.func @transform_1(%arg0: i32) -> (i32, i32, i32) {
    %c0_i32 = arith.constant 0 : i32
    %c0_i32_0 = arith.constant 0 : i32
    %c0_i32_1 = arith.constant 0 : i32
    %c0_i32_2 = arith.constant 0 : i32
    return %c0_i32, %c0_i32_0, %c0_i32_1 : i32, i32, i32
  }
  func.func @transform_2(%arg0: i32) -> (i32, i32) {
    %c0_i32 = arith.constant 0 : i32
    %c0_i32_0 = arith.constant 0 : i32
    %c0_i32_1 = arith.constant 0 : i32
    return %c0_i32, %c0_i32_0 : i32, i32
  }
  func.func @transform_3(%arg0: i32) -> (i32, i32) {
    %c0_i32 = arith.constant 0 : i32
    %c0_i32_0 = arith.constant 0 : i32
    %c0_i32_1 = arith.constant 0 : i32
    return %c0_i32, %c0_i32_0 : i32, i32
  }
  func.func @transform_4(%arg0: i32) -> (i32, i32) {
    %c0_i32 = arith.constant 0 : i32
    %c0_i32_0 = arith.constant 0 : i32
    %c0_i32_1 = arith.constant 0 : i32
    return %c0_i32, %c0_i32_0 : i32, i32
  }
  func.func @transform_5(%arg0: i32) -> (i32, i32) {
    %c0_i32 = arith.constant 0 : i32
    %c0_i32_0 = arith.constant 0 : i32
    return %arg0, %c0_i32 : i32, i32
  }
}

</mosaic_0001>

<bundles_post_ra>
// kernel: textcnn_forward.1
= control target key start
LH: loop header
LB: loop body
LE: loop exit
PB: predicated region body
PF: predicated region fallthrough
CT: control target
= control target key end

     0   :  { %vm446_vm0 = vsmask.f32 3328  ;;  %vm447_vm1 = vsmask.f32 7440  ;;  %vm150_vm2 = vcmask 261120   ;;  %vm1203_vm4 = vcmask 1042432   ;;  %s3231_s1 = inlined_call_operand.vmem [shape: bf16[3,32,32], index: 1, kind: input, shape index: {}]   ;;  %s3232_s0 = inlined_call_operand.vmem [shape: bf16[16,18,32], index: 0, kind: input, shape index: {}]   ;;  %s3233_s3 = inlined_call_operand.vmem [shape: f32[32,128], index: 3, kind: input, shape index: {}]   ;;  %s3234_s2 = inlined_call_operand.vmem [shape: f32[1,32], index: 2, kind: input, shape index: {}]   ;;  %s3235_s4 = inlined_call_operand.vmem [shape: f32[1,128], index: 4, kind: input, shape index: {}]   ;;  %s3236_s5 = inlined_call_operand.vmem [shape: f32[16,128], index: 5, kind: output, shape index: {}]  }
   0x1   :  { %v2350_v0 = vld [vmem:[%s3231_s1] sm:$0xff]   ;;  %v2351_v1 = vld [vmem:[%s3231_s1 + $0x10] sm:$0xff]   ;;  %v2352_v2 = vld [vmem:[%s3231_s1 + $0x8] sm:$0xff]   ;;  %vm1204_vm5 = vcmask 1046532   ;;  %vm1827_vm7 = vcmask 1041409   ;;  %vm1829_vm8 = vcmask 1042434  }
   0x2   :  { %2123 = vmatprep.subr.bf16.mxu1 %v2350_v0  ;;  %2159 = vmatprep.subr.bf16.mxu0 %v2351_v1  ;;  %v2353_v3 = vld [vmem:[%s3231_s1 + $0x18] sm:$0xff]   ;;  %v2354_v4 = vld [vmem:[%s3232_s0] sm:$0xff]   ;;  %v2355_v5 = vld [vmem:[%s3232_s0 + $0xc] sm:$0xff]   ;;  %vm1831_vm9 = vcmask 1043459   ;;  %vm1833_vm10 = vcmask 1044484   ;;  %vm1835_vm11 = vcmask 1045509  }
   0x3   :  { %2124 = vmatpush3.bf16.msra.mxu1 %v2350_v0  ;;  %2160 = vmatpush3.bf16.msra.mxu0 %v2351_v1  ;;  %v398_v6 = vld [vmem:[%s3232_s0] sm:$0xf]  ;;  %v2427_v7 = vld [vmem:[%s3232_s0 + $0x4] sm:$0xf]  ;;  %v2432_v8 = vld [vmem:[%s3232_s0 + $0x8] sm:$0x1] }
   0x4   :  { %2125 = vmatprep.subr.bf16.mxu1 %v2352_v2  ;;  %2161 = vmatprep.subr.bf16.mxu0 %v2353_v3  ;;  %v450_v9 = vshrl.u32 %v398_v6, 16  ;;  %v453_v10 = vshll.u32 %v398_v6, 16  ;;  %v459_v11 = vshll.u32 %v2427_v7, 16  ;;  %v463_v12 = vshrl.u32 %v2427_v7, 16  ;;  %v2442_v16 = vld [vmem:[%s3231_s1 + $0x20] sm:$0xff]   ;;  %vm2462_vm3 = vmor %vm446_vm0, %vm447_vm1  ;;  %v2357_v35 = vld [vmem:[%s3232_s0 + $0x18] sm:$0xff]  }
   0x5   :  { %2127 = vmatprep.mubr.msk.bf16.mxu1 %vm150_vm2, %v2354_v4  ;;  %v469_v13 = vshll.u32 %v2432_v8, 16  ;;  %v1208_v14 = vrot.slane %v2427_v7, 5  ;;  %v1211_v15 = vrot.slane %v2432_v8, 5  ;;  %v401_v21 = vld [vmem:[%s3232_s0 + $0xc] sm:$0xf]  ;;  %v2358_v43 = vld [vmem:[%s3232_s0 + $0x24] sm:$0xff]   ;;  %vm2693_vm6 = vmor %vm1203_vm4, %vm1204_vm5 }
   0x6   :  { %v452_v17 = vrot.slane %v450_v9, 4  ;;  %v455_v18 = vrot.slane %v453_v10, 5  ;;  %v461_v19 = vrot.slane %v459_v11, 5  ;;  %v465_v20 = vrot.slane %v463_v12, 4  ;;  %v2452_v23 = vld [vmem:[%s3232_s0 + $0x10] sm:$0xf] }
   0x7   :  { %2126 = vmatpush3.bf16.msra.mxu1 %v2352_v2  ;;  %2162 = vmatpush3.bf16.msra.mxu0 %v2353_v3  ;;  %v471_v22 = vrot.slane %v469_v13, 5  ;;  %v2457_v24 = vld [vmem:[%s3232_s0 + $0x14] sm:$0x1]  ;;  %v474_v25 = vshrl.u32 %v401_v21, 16  ;;  %v477_v28 = vshll.u32 %v401_v21, 16  ;;  %v483_v29 = vshll.u32 %v2452_v23, 16 }
   0x8   :  { %2250 = vmatprep.subr.bf16.mxu1 %v2351_v1  ;;  %2195 = vmatprep.subr.bf16.mxu0 %v2442_v16  ;;  %v456_v26 = vor.u32 %v455_v18, %v452_v17  ;;  %v466_v27 = vor.u32 %v465_v20, %v461_v19  ;;  %v487_v32 = vshrl.u32 %v2452_v23, 16  ;;  %v493_v33 = vshll.u32 %v2457_v24, 16  ;;  %v404_v47 = vld [vmem:[%s3232_s0 + $0x18] sm:$0xf]  ;;  %v2490_v48 = vld [vmem:[%s3232_s0 + $0x1c] sm:$0xf] }
   0x9   :  { %v476_v31 = vrot.slane %v474_v25, 4  ;;  %v1215_v34 = vrot.slane %v2452_v23, 5  ;;  %v479_v38 = vrot.slane %v477_v28, 5  ;;  %v485_v39 = vrot.slane %v483_v29, 5  ;;  %v2495_v49 = vld [vmem:[%s3232_s0 + $0x20] sm:$0x1] }
   0xa   :  { %2128 = vmatmul.mubr.msk.bf16.vlgmr.msra.gmra.mrb[0].mxu1 %vm150_vm2, %v2355_v5  ;;  %v457_v36 = vrot.slane %v456_v26, 4  ;;  %v467_v37 = vrot.slane %v466_v27, 4  ;;  %v489_v40 = vrot.slane %v487_v32, 4  ;;  %v495_v41 = vrot.slane %v493_v33, 5  ;;  %v407_v54 = vld [vmem:[%s3232_s0 + $0x24] sm:$0xf] }
   0xb   :  { %2252 = vmatpush3.bf16.msra.mxu1 %v2351_v1  ;;  %v2474_v42 = vrot.slane %v1215_v34, 4  ;;  %2131 = vmatprep.mubr.msk.bf16.mxu1 %vm150_vm2, %v2357_v35  ;;  %v480_v46 = vor.u32 %v479_v38, %v476_v31  ;;  %v498_v52 = vshrl.u32 %v404_v47, 16  ;;  %v501_v53 = vshll.u32 %v404_v47, 16  ;;  %v2503_v55 = vld [vmem:[%s3232_s0 + $0x28] sm:$0xf]  ;;  %v2359_v5 = vld [vmem:[%s3232_s0 + $0x30] sm:$0xff]  }
   0xc   :  { %2251 = vmatprep.subr.bf16.mxu1 %v2353_v3  ;;  %v462_v44 = vsel %vm2462_vm3, %v457_v36, %v461_v19  ;;  %v472_v45 = vsel %vm2462_vm3, %v467_v37, %v471_v22  ;;  %v490_v51 = vor.u32 %v489_v40, %v485_v39  ;;  %v507_v57 = vshll.u32 %v2490_v48, 16  ;;  %v2511_v60 = vld [vmem:[%s3232_s0 + $0x2c] sm:$0x1]  ;;  %v2360_v19 = vld [vmem:[%s3232_s0 + $0x3c] sm:$0xff]   ;;  %v410_v20 = vld [vmem:[%s3232_s0 + $0x30] sm:$0xf] }
   0xd   :  { %v1972_v50 = vcombine.low %v462_v44, %v472_v45  ;;  %v481_v56 = vrot.slane %v480_v46, 4  ;;  %v511_v58 = vshrl.u32 %v2490_v48, 16  ;;  %v517_v59 = vshll.u32 %v2495_v49, 16  ;;  %v2361_v21 = vld [vmem:[%s3231_s1 + $0x28] sm:$0xff]   ;;  %v2538_v27 = vld [vmem:[%s3232_s0 + $0x34] sm:$0xf] }
   0xe   :  { %v491_v61 = vrot.slane %v490_v51, 4  ;;  %v500_v62 = vrot.slane %v498_v52, 4  ;;  %v503_v63 = vrot.slane %v501_v53, 5  ;;  %v522_v0 = vshrl.u32 %v407_v54, 16  ;;  %v2544_v33 = vld [vmem:[%s3232_s0 + $0x38] sm:$0x1] }
   0xf   :  { %2253 = vmatpush3.bf16.msra.mxu1 %v2353_v3  ;;  %2163 = vmatprep.mubr.msk.bf16.mxu0 %vm150_vm2, %v1972_v50  ;;  %v486_v1 = vsel %vm2462_vm3, %v481_v56, %v485_v39  ;;  %v509_v2 = vrot.slane %v507_v57, 5  ;;  %v513_v3 = vrot.slane %v511_v58, 4  ;;  %v519_v4 = vrot.slane %v517_v59, 5  ;;  %v413_v40 = vld [vmem:[%s3232_s0 + $0x3c] sm:$0xf]  ;;  %v2362_v53 = vld [vmem:[%s3232_s0 + $0x48] sm:$0xff]  }
  0x10   :  { %v496_v6 = vsel %vm2462_vm3, %v491_v61, %v495_v41  ;;  %v504_v9 = vor.u32 %v503_v63, %v500_v62  ;;  %v524_v10 = vrot.slane %v522_v0, 4  ;;  %v525_v11 = vshll.u32 %v407_v54, 16  ;;  %v2566_v52 = vld [vmem:[%s3232_s0 + $0x44] sm:$0x1]  ;;  %v1143_v8 = vld [vmem:[%s3232_s0 + $0x30] sm:$0xe] }
  0x11   :  { %v1973_v12 = vcombine.low %v486_v1, %v496_v6  ;;  %v514_v13 = vor.u32 %v513_v3, %v509_v2  ;;  %v531_v17 = vshll.u32 %v2503_v55, 16  ;;  %v535_v18 = vshrl.u32 %v2503_v55, 16  ;;  %v2370_v23 = vld [vmem:[%s3232_s0 + $0xa8] sm:$0xff]  }
  0x12   :  { %2132 = vmatmul.mubr.msk.bf16.gmra.mrb[4].mxu1 %vm150_vm2, %v2358_v43  ;;  %v505_v22 = vrot.slane %v504_v9, 4  ;;  %v527_v25 = vrot.slane %v525_v11, 5  ;;  %v541_v26 = vshll.u32 %v2511_v60, 16  ;;  %v546_v28 = vshrl.u32 %v410_v20, 16  ;;  %v416_v11 = vld [vmem:[%s3232_s0 + $0x48] sm:$0xf] }
  0x13   :  { %2135 = vmatprep.mubr.msk.bf16.mxu1 %vm150_vm2, %v2359_v5  ;;  %2164 = vmatmul.mubr.msk.bf16.vlgmr.msra.gmra.mrb[0].mxu0 %vm150_vm2, %v1973_v12  ;;  %v515_v29 = vrot.slane %v514_v13, 4  ;;  %v533_v31 = vrot.slane %v531_v17, 5  ;;  %v537_v32 = vrot.slane %v535_v18, 4  ;;  %v549_v35 = vshll.u32 %v410_v20, 16  ;;  %v2364_v20 = vld [vmem:[%s3232_s0 + $0x60] sm:$0xff]  }
  0x14   :  { %2196 = vmatpush3.bf16.msra.mxu0 %v2442_v16  ;;  %v510_v36 = vsel %vm2462_vm3, %v505_v22, %v509_v2  ;;  %v528_v37 = vor.u32 %v527_v25, %v524_v10  ;;  %v543_v38 = vrot.slane %v541_v26, 5  ;;  %v548_v39 = vrot.slane %v546_v28, 4  ;;  %v2558_v16 = vld [vmem:[%s3232_s0 + $0x40] sm:$0xf]  ;;  %v2601_v26 = vld [vmem:[%s3232_s0 + $0x50] sm:$0x1] }
  0x15   :  { %v520_v41 = vsel %vm2462_vm3, %v515_v29, %v519_v4  ;;  %v538_v43 = vor.u32 %v537_v32, %v533_v31  ;;  %v551_v44 = vrot.slane %v549_v35, 5  ;;  %v555_v45 = vshll.u32 %v2538_v27, 16  ;;  %2197 = vmatprep.subr.bf16.mxu0 %v2361_v21  ;;  %v2363_v4 = vld [vmem:[%s3232_s0 + $0x54] sm:$0xff]  }
  0x16   :  { %v1974_v46 = vcombine.low %v510_v36, %v520_v41  ;;  %v529_v47 = vrot.slane %v528_v37, 4  ;;  %v559_v50 = vshrl.u32 %v2538_v27, 16  ;;  %v565_v51 = vshll.u32 %v2544_v33, 16  ;;  %v419_v36 = vld [vmem:[%s3232_s0 + $0x54] sm:$0xf] }
  0x17   :  { %v539_v54 = vrot.slane %v538_v43, 4  ;;  %v552_v56 = vor.u32 %v551_v44, %v548_v39  ;;  %v557_v57 = vrot.slane %v555_v45, 5  ;;  %v570_v58 = vshrl.u32 %v413_v40, 16  ;;  %v2614_v41 = vld [vmem:[%s3232_s0 + $0x58] sm:$0xf] }
  0x18   :  { %2167 = vmatprep.mubr.msk.bf16.mxu0 %vm150_vm2, %v1974_v46  ;;  %v534_v59 = vsel %vm2462_vm3, %v529_v47, %v533_v31  ;;  %v561_v61 = vrot.slane %v559_v50, 4  ;;  %v567_v62 = vrot.slane %v565_v51, 5  ;;  %v573_v63 = vshll.u32 %v413_v40, 16  ;;  %2198 = vmatpush3.bf16.msra.mxu0 %v2361_v21  ;;  %v2619_v47 = vld [vmem:[%s3232_s0 + $0x5c] sm:$0x1] }
  0x19   :  { %v544_v0 = vsel %vm2462_vm3, %v539_v54, %v543_v38  ;;  %v553_v1 = vrot.slane %v552_v56, 4  ;;  %v572_v2 = vrot.slane %v570_v58, 4  ;;  %v579_v3 = vshll.u32 %v2558_v16, 16 }
  0x1a   :  { %2136 = vmatmul.mubr.msk.bf16.gmra.mrb[8].mxu1 %vm150_vm2, %v2360_v19  ;;  %v1975_v5 = vcombine.low %v534_v59, %v544_v0  ;;  %v562_v6 = vor.u32 %v561_v61, %v557_v57  ;;  %v575_v9 = vrot.slane %v573_v63, 5  ;;  %v583_v10 = vshrl.u32 %v2558_v16, 16  ;;  %v2592_v19 = vld [vmem:[%s3232_s0 + $0x4c] sm:$0xf]  ;;  %v422_v61 = vld [vmem:[%s3232_s0 + $0x60] sm:$0xf] }
  0x1b   :  { %2139 = vmatprep.mubr.msk.bf16.mxu1 %vm150_vm2, %v2362_v53  ;;  %v1218_v12 = vrot.slane %v2457_v24, 5  ;;  %v558_v13 = vsel %vm2462_vm3, %v553_v1, %v557_v57  ;;  %v581_v17 = vrot.slane %v579_v3, 5  ;;  %v589_v18 = vshll.u32 %v2566_v52, 16 }
  0x1c   :  { %2168 = vmatmul.mubr.msk.bf16.gmra.mrb[4].mxu0 %vm150_vm2, %v1975_v5  ;;  %v563_v21 = vrot.slane %v562_v6, 4  ;;  %v576_v22 = vor.u32 %v575_v9, %v572_v2  ;;  %v585_v25 = vrot.slane %v583_v10, 4  ;;  %v594_v28 = vshrl.u32 %v416_v11, 16  ;;  %v2365_v2 = vld [vmem:[%s3232_s0 + $0x6c] sm:$0xff]   ;;  %v2366_v9 = vld [vmem:[%s3232_s0 + $0x78] sm:$0xff]  }
  0x1d   :  { %v591_v29 = vrot.slane %v589_v18, 5  ;;  %v597_v31 = vshll.u32 %v416_v11, 16  ;;  %v603_v32 = vshll.u32 %v2592_v19, 16  ;;  %v607_v35 = vshrl.u32 %v2592_v19, 16 }
  0x1e   :  { %v568_v37 = vsel %vm2462_vm3, %v563_v21, %v567_v62  ;;  %v577_v38 = vrot.slane %v576_v22, 4  ;;  %v586_v39 = vor.u32 %v585_v25, %v581_v17  ;;  %v596_v40 = vrot.slane %v594_v28, 4  ;;  %v2653_v25 = vld [vmem:[%s3232_s0 + $0x68] sm:$0x1] }
  0x1f   :  { %v1976_v43 = vcombine.low %v558_v13, %v568_v37  ;;  %v599_v44 = vrot.slane %v597_v31, 5  ;;  %v605_v45 = vrot.slane %v603_v32, 5  ;;  %v609_v46 = vrot.slane %v607_v35, 4  ;;  %v2662_v37 = vld [vmem:[%s3232_s0 + $0x70] sm:$0xf] }
  0x20   :  { %v582_v50 = vsel %vm2462_vm3, %v577_v38, %v581_v17  ;;  %v587_v51 = vrot.slane %v586_v39, 4  ;;  %v613_v53 = vshll.u32 %v2601_v26, 16  ;;  %v618_v54 = vshrl.u32 %v419_v36, 16  ;;  %v2643_v17 = vld [vmem:[%s3232_s0 + $0x64] sm:$0xf] }
  0x21   :  { %2171 = vmatprep.mubr.msk.bf16.mxu0 %vm150_vm2, %v1976_v43  ;;  %v600_v56 = vor.u32 %v599_v44, %v596_v40  ;;  %v610_v57 = vor.u32 %v609_v46, %v605_v45  ;;  %v621_v58 = vshll.u32 %v419_v36, 16  ;;  %v627_v59 = vshll.u32 %v2614_v41, 16 }
  0x22   :  { %2140 = vmatmul.mubr.msk.bf16.gmra.mrb[12].mxu1 %vm150_vm2, %v2363_v4  ;;  %v592_v62 = vsel %vm2462_vm3, %v587_v51, %v591_v29  ;;  %v615_v63 = vrot.slane %v613_v53, 5  ;;  %v620_v0 = vrot.slane %v618_v54, 4  ;;  %v631_v1 = vshrl.u32 %v2614_v41, 16  ;;  %v425_v29 = vld [vmem:[%s3232_s0 + $0x6c] sm:$0xf]  ;;  %v2367_v51 = vld [vmem:[%s3232_s0 + $0x84] sm:$0xff]  }
  0x23   :  { %2143 = vmatprep.mubr.msk.bf16.mxu1 %vm150_vm2, %v2364_v20  ;;  %v1977_v3 = vcombine.low %v582_v50, %v592_v62  ;;  %v601_v4 = vrot.slane %v600_v56, 4  ;;  %v611_v5 = vrot.slane %v610_v57, 4  ;;  %v623_v6 = vrot.slane %v621_v58, 5  ;;  %v2677_v58 = vld [vmem:[%s3232_s0 + $0x74] sm:$0x1] }
  0x24   :  { %v629_v10 = vrot.slane %v627_v59, 5  ;;  %v633_v11 = vrot.slane %v631_v1, 4  ;;  %v637_v13 = vshll.u32 %v2619_v47, 16  ;;  %v642_v18 = vshrl.u32 %v422_v61, 16  ;;  %v1139_v59 = vld [vmem:[%s3232_s0] sm:$0xe] }
  0x25   :  { %2172 = vmatmul.mubr.msk.bf16.gmra.mrb[8].mxu0 %vm150_vm2, %v1977_v3  ;;  %v606_v20 = vsel %vm2462_vm3, %v601_v4, %v605_v45  ;;  %v616_v21 = vsel %vm2462_vm3, %v611_v5, %v615_v63  ;;  %v624_v22 = vor.u32 %v623_v6, %v620_v0  ;;  %v645_v28 = vshll.u32 %v422_v61, 16  ;;  %v1140_v1 = vld [vmem:[%s3232_s0 + $0xc] sm:$0xe] }
  0x26   :  { %v1978_v31 = vcombine.low %v606_v20, %v616_v21  ;;  %v634_v32 = vor.u32 %v633_v11, %v629_v10  ;;  %v639_v35 = vrot.slane %v637_v13, 5  ;;  %v644_v36 = vrot.slane %v642_v18, 4 }
  0x27   :  { %v625_v38 = vrot.slane %v624_v22, 4  ;;  %v647_v39 = vrot.slane %v645_v28, 5  ;;  %v651_v40 = vshll.u32 %v2643_v17, 16  ;;  %v655_v43 = vshrl.u32 %v2643_v17, 16 }
  0x28   :  { %2175 = vmatprep.mubr.msk.bf16.mxu0 %vm150_vm2, %v1978_v31  ;;  %v635_v44 = vrot.slane %v634_v32, 4  ;;  %v661_v45 = vshll.u32 %v2653_v25, 16  ;;  %v666_v46 = vshrl.u32 %v425_v29, 16  ;;  %v669_v50 = vshll.u32 %v425_v29, 16  ;;  %v1141_v29 = vld [vmem:[%s3232_s0 + $0x18] sm:$0xe] }
  0x29   :  { %v630_v53 = vsel %vm2462_vm3, %v625_v38, %v629_v10  ;;  %v648_v54 = vor.u32 %v647_v39, %v644_v36  ;;  %v653_v56 = vrot.slane %v651_v40, 5  ;;  %v657_v57 = vrot.slane %v655_v43, 4  ;;  %v1142_v38 = vld [vmem:[%s3232_s0 + $0x24] sm:$0xe] }
  0x2a   :  { %2144 = vmatmul.mubr.msk.bf16.gmra.mrb[16].mxu1 %vm150_vm2, %v2365_v2  ;;  %v640_v61 = vsel %vm2462_vm3, %v635_v44, %v639_v35  ;;  %v663_v62 = vrot.slane %v661_v45, 5  ;;  %v668_v63 = vrot.slane %v666_v46, 4  ;;  %v671_v0 = vrot.slane %v669_v50, 5  ;;  %v2368_v2 = vld [vmem:[%s3232_s0 + $0x90] sm:$0xff]  }
  0x2b   :  { %2147 = vmatprep.mubr.msk.bf16.mxu1 %vm150_vm2, %v2366_v9  ;;  %v1979_v3 = vcombine.low %v630_v53, %v640_v61  ;;  %v649_v4 = vrot.slane %v648_v54, 4  ;;  %v658_v5 = vor.u32 %v657_v57, %v653_v56  ;;  %v675_v6 = vshll.u32 %v2662_v37, 16  ;;  %v1802_v9 = vld [vmem:[%s3233_s3 + $0x10] sm:$0xff] }
  0x2c   :  { %v672_v10 = vor.u32 %v671_v0, %v668_v63  ;;  %v679_v11 = vshrl.u32 %v2662_v37, 16  ;;  %v685_v13 = vshll.u32 %v2677_v58, 16  ;;  %v2006_v18 = vrot.slane %v1139_v59, 9  ;;  %v1144_v59 = vld [vmem:[%s3232_s0 + $0x3c] sm:$0xe] }
  0x2d   :  { %2176 = vmatmul.mubr.msk.bf16.gmra.mrb[12].mxu0 %vm150_vm2, %v1979_v3  ;;  %v654_v20 = vsel %vm2462_vm3, %v649_v4, %v653_v56  ;;  %v659_v21 = vrot.slane %v658_v5, 4  ;;  %v677_v22 = vrot.slane %v675_v6, 5  ;;  %v1210_v28 = vrot.slane %v1208_v14, 4  ;;  %v428_v63 = vld [vmem:[%s3232_s0 + $0x78] sm:$0xf] }
  0x2e   :  { %v673_v31 = vrot.slane %v672_v10, 4  ;;  %v681_v32 = vrot.slane %v679_v11, 4  ;;  %v687_v35 = vrot.slane %v685_v13, 5  ;;  %v1209_v36 = vsel %vm2693_vm6, %v2006_v18, %v1208_v14  ;;  %v2786_v6 = vld [vmem:[%s3232_s0 + $0x7c] sm:$0xf] }
  0x2f   :  { %v664_v39 = vsel %vm2462_vm3, %v659_v21, %v663_v62  ;;  %v1212_v40 = vsel %vm2693_vm6, %v1210_v28, %v1211_v15  ;;  %v2007_v43 = vrot.slane %v1140_v1, 9  ;;  %v2008_v44 = vrot.slane %v1141_v29, 9  ;;  %v2791_v10 = vld [vmem:[%s3232_s0 + $0x80] sm:$0x1] }
  0x30   :  { %v1980_v7 = vcombine.low %v654_v20, %v664_v39  ;;  %v678_v14 = vsel %vm2462_vm3, %v673_v31, %v677_v22  ;;  %v682_v45 = vor.u32 %v681_v32, %v677_v22  ;;  %v2729_v46 = vsel %vm2693_vm6, %v2474_v42, %v1218_v12  ;;  %v2369_v42 = vld [vmem:[%s3232_s0 + $0x9c] sm:$0xff]   ;;  %v431_v20 = vld [vmem:[%s3232_s0 + $0x84] sm:$0xf]  ;;  %v2812_v31 = vld [vmem:[%s3232_s0 + $0x88] sm:$0xf] }
  0x31   :  { %v2026_v15 = vcombine.low %v1209_v36, %v1212_v40  ;;  %v1222_v50 = vrot.slane %v2490_v48, 5  ;;  %v2009_v53 = vrot.slane %v1142_v38, 9  ;;  %v2741_v24 = vsel %vm2693_vm6, %v2007_v43, %v1215_v34  ;;  %v2820_v38 = vld [vmem:[%s3232_s0 + $0x8c] sm:$0x1]  ;;  %v2371_v39 = vld [vmem:[%s3232_s0 + $0xb4] sm:$0xff]  }
  0x32   :  { %2148 = vmatmul.mubr.msk.bf16.gmra.mrb[20].mxu1 %vm150_vm2, %v2367_v51  ;;  %v1225_v51 = vrot.slane %v2495_v49, 5  ;;  %2179 = vmatprep.mubr.msk.bf16.mxu0 %vm150_vm2, %v1980_v7  ;;  %v683_v54 = vrot.slane %v682_v45, 4  ;;  %v1229_v12 = vrot.slane %v2503_v55, 5  ;;  %v1232_v48 = vrot.slane %v2511_v60, 5 }
  0x33   :  { %2151 = vmatprep.mubr.msk.bf16.mxu1 %vm150_vm2, %v2368_v2  ;;  %v2750_v49 = vsel %vm2693_vm6, %v2008_v44, %v1222_v50  ;;  %v1224_v56 = vrot.slane %v1222_v50, 4  ;;  %v2010_v57 = vrot.slane %v1143_v8, 9  ;;  %v1236_v34 = vrot.slane %v2538_v27, 5 }
  0x34   :  { %v688_v55 = vsel %vm2462_vm3, %v683_v54, %v687_v35  ;;  %v2763_v60 = vsel %vm2693_vm6, %v2009_v53, %v1229_v12  ;;  %v1231_v61 = vrot.slane %v1229_v12, 4  ;;  %v1239_v62 = vrot.slane %v2544_v33, 5 }
  0x35   :  { %v1981_v0 = vcombine.low %v678_v14, %v688_v55  ;;  %v1226_v27 = vsel %vm2693_vm6, %v1224_v56, %v1225_v51  ;;  %v2773_v1 = vsel %vm2693_vm6, %v2010_v57, %v1236_v34  ;;  %v1238_v2 = vrot.slane %v1236_v34, 4  ;;  %v1145_v14 = vld [vmem:[%s3232_s0 + $0x48] sm:$0xe]  ;;  %v1146_v34 = vld [vmem:[%s3232_s0 + $0x54] sm:$0xe] }
  0x36   :  { %v2027_v3 = vcombine.low %v2741_v24, %v2729_v46  ;;  %v2780_v33 = vsel %vm2693_vm6, %v1231_v61, %v1232_v48  ;;  %v2011_v4 = vrot.slane %v1144_v59, 9  ;;  %v1243_v5 = vrot.slane %v2558_v16, 5 }
  0x37   :  { %2180 = vmatmul.mubr.msk.bf16.gmra.mrb[16].mxu0 %vm150_vm2, %v1981_v0  ;;  %v2028_v11 = vcombine.low %v2750_v49, %v1226_v27  ;;  %v2798_v13 = vsel %vm2693_vm6, %v1238_v2, %v1239_v62  ;;  %v1246_v16 = vrot.slane %v2566_v52, 5  ;;  %v690_v18 = vshrl.u32 %v428_v63, 16 }
  0x38   :  { %2199 = vmatprep.mubr.msk.bf16.mxu0 %vm150_vm2, %v2026_v15  ;;  %v2029_v21 = vcombine.low %v2763_v60, %v2780_v33  ;;  %v2030_v22 = vcombine.low %v2773_v1, %v2798_v13  ;;  %v1245_v28 = vrot.slane %v1243_v5, 4  ;;  %v693_v29 = vshll.u32 %v428_v63, 16  ;;  %v1148_v13 = vld [vmem:[%s3232_s0 + $0x6c] sm:$0xe] }
  0x39   :  { %v692_v52 = vrot.slane %v690_v18, 4  ;;  %v699_v32 = vshll.u32 %v2786_v6, 16  ;;  %v703_v35 = vshrl.u32 %v2786_v6, 16  ;;  %v709_v36 = vshll.u32 %v2791_v10, 16 }
  0x3a   :  { %2152 = vmatmul.mubr.msk.bf16.gmra.mrb[24].mxu1 %vm150_vm2, %v2369_v42  ;;  %v2827_v40 = vsel %vm2693_vm6, %v2011_v4, %v1243_v5  ;;  %v695_v43 = vrot.slane %v693_v29, 5  ;;  %v714_v44 = vshrl.u32 %v431_v20, 16  ;;  %v717_v7 = vshll.u32 %v431_v20, 16  ;;  %v437_v29 = vld [vmem:[%s3232_s0 + $0x9c] sm:$0xf] }
  0x3b   :  { %2155 = vmatprep.mubr.msk.bf16.mxu1 %vm150_vm2, %v2370_v23  ;;  %v2834_v45 = vsel %vm2693_vm6, %v1245_v28, %v1246_v16  ;;  %v701_v46 = vrot.slane %v699_v32, 5  ;;  %v705_v8 = vrot.slane %v703_v35, 4  ;;  %v711_v15 = vrot.slane %v709_v36, 5 }
  0x3c   :  { %v696_v50 = vor.u32 %v695_v43, %v692_v52  ;;  %v716_v51 = vrot.slane %v714_v44, 4  ;;  %v719_v53 = vrot.slane %v717_v7, 5  ;;  %v723_v54 = vshll.u32 %v2812_v31, 16 }
  0x3d   :  { %v706_v24 = vor.u32 %v705_v8, %v701_v46  ;;  %v727_v42 = vshrl.u32 %v2812_v31, 16  ;;  %v733_v12 = vshll.u32 %v2820_v38, 16  ;;  %v2012_v48 = vrot.slane %v1145_v14, 9  ;;  %v2896_v8 = vld [vmem:[%s3232_s0 + $0xa0] sm:$0xf] }
  0x3e   :  { %v697_v49 = vrot.slane %v696_v50, 4  ;;  %v720_v56 = vor.u32 %v719_v53, %v716_v51  ;;  %v725_v23 = vrot.slane %v723_v54, 5  ;;  %v1250_v57 = vrot.slane %v2592_v19, 5 }
  0x3f   :  { %2200 = vmatmul.mubr.msk.bf16.vlgmr.msra.gmra.mrb[0].mxu0 %vm150_vm2, %v2027_v3  ;;  %v707_v59 = vrot.slane %v706_v24, 4  ;;  %v729_v55 = vrot.slane %v727_v42, 4  ;;  %v735_v61 = vrot.slane %v733_v12, 5  ;;  %v1253_v62 = vrot.slane %v2601_v26, 5  ;;  %v434_v26 = vld [vmem:[%s3232_s0 + $0x90] sm:$0xf] }
  0x40   :  { %2203 = vmatprep.mubr.msk.bf16.mxu0 %vm150_vm2, %v2028_v11  ;;  %v702_v63 = vsel %vm2462_vm3, %v697_v49, %v701_v46  ;;  %v721_v0 = vrot.slane %v720_v56, 4  ;;  %v2851_v19 = vsel %vm2693_vm6, %v2012_v48, %v1250_v57  ;;  %v1252_v27 = vrot.slane %v1250_v57, 4  ;;  %v2862_v11 = vld [vmem:[%s3232_s0 + $0x94] sm:$0xf]  ;;  %v2905_v24 = vld [vmem:[%s3232_s0 + $0xa4] sm:$0x1] }
  0x41   :  { %v712_v2 = vsel %vm2462_vm3, %v707_v59, %v711_v15  ;;  %v730_v3 = vor.u32 %v729_v55, %v725_v23  ;;  %v2013_v4 = vrot.slane %v1146_v34, 9  ;;  %v1257_v5 = vrot.slane %v2614_v41, 5  ;;  %v2874_v41 = vld [vmem:[%s3232_s0 + $0x98] sm:$0x1]  ;;  %v1147_v42 = vld [vmem:[%s3232_s0 + $0x60] sm:$0xe] }
  0x42   :  { %2156 = vmatmul.mubr.msk.bf16.gmra.mrb[28].mxu1 %vm150_vm2, %v2371_v39  ;;  %v2031_v16 = vcombine.low %v2827_v40, %v2834_v45  ;;  %v1982_v18 = vcombine.low %v702_v63, %v712_v2  ;;  %v2868_v20 = vsel %vm2693_vm6, %v1252_v27, %v1253_v62  ;;  %v1260_v28 = vrot.slane %v2619_v47, 5 }
  0x43   :  { %v726_v52 = vsel %vm2462_vm3, %v721_v0, %v725_v23  ;;  %v731_v32 = vrot.slane %v730_v3, 4  ;;  %v2032_v35 = vcombine.low %v2851_v19, %v2868_v20  ;;  %v1259_v36 = vrot.slane %v1257_v5, 4 }
  0x44   :  { %2183 = vmatprep.mubr.msk.bf16.mxu1 %vm150_vm2, %v1982_v18  ;;  %v738_v47 = vshrl.u32 %v434_v26, 16  ;;  %v741_v39 = vshll.u32 %v434_v26, 16  ;;  %v747_v43 = vshll.u32 %v2862_v11, 16  ;;  %v751_v44 = vshrl.u32 %v2862_v11, 16 }
  0x45   :  { %v736_v7 = vsel %vm2462_vm3, %v731_v32, %v735_v61  ;;  %v2890_v14 = vsel %vm2693_vm6, %v2013_v4, %v1257_v5  ;;  %v757_v46 = vshll.u32 %v2874_v41, 16  ;;  %v762_v15 = vshrl.u32 %v437_v29, 16  ;;  %v440_v5 = vld [vmem:[%s3232_s0 + $0xa8] sm:$0xf] }
  0x46   :  { %v1983_v50 = vcombine.low %v726_v52, %v736_v7  ;;  %v2900_v51 = vsel %vm2693_vm6, %v1259_v36, %v1260_v28  ;;  %v740_v53 = vrot.slane %v738_v47, 4  ;;  %v743_v54 = vrot.slane %v741_v39, 5  ;;  %v2940_v28 = vld [vmem:[%s3232_s0 + $0xac] sm:$0xf]  ;;  %v2954_v39 = vld [vmem:[%s3232_s0 + $0xb0] sm:$0x1] }
  0x47   :  { %2204 = vmatmul.mubr.msk.bf16.gmra.mrb[4].mxu0 %vm150_vm2, %v2029_v21  ;;  %v749_v12 = vrot.slane %v747_v43, 5  ;;  %v753_v48 = vrot.slane %v751_v44, 4  ;;  %v759_v49 = vrot.slane %v757_v46, 5  ;;  %v764_v56 = vrot.slane %v762_v15, 4  ;;  %v2969_v7 = vld [vmem:[%s3232_s0 + $0xb8] sm:$0xf] }
  0x48   :  { %2207 = vmatprep.mubr.msk.bf16.mxu0 %vm150_vm2, %v2030_v22  ;;  %v744_v23 = vor.u32 %v743_v54, %v740_v53  ;;  %v765_v57 = vshll.u32 %v437_v29, 16  ;;  %v771_v34 = vshll.u32 %v2896_v8, 16  ;;  %v775_v59 = vshrl.u32 %v2896_v8, 16 }
  0x49   :  { %v754_v60 = vor.u32 %v753_v48, %v749_v12  ;;  %v781_v33 = vshll.u32 %v2905_v24, 16  ;;  %v2014_v21 = vrot.slane %v1147_v42, 9  ;;  %v1264_v55 = vrot.slane %v2643_v17, 5 }
  0x4a   :  { %2184 = vmatmul.mubr.msk.bf16.vlgmr.msra.gmra.mrb[20].mxu1 %vm150_vm2, %v1983_v50  ;;  %v745_v61 = vrot.slane %v744_v23, 4  ;;  %v767_v62 = vrot.slane %v765_v57, 5  ;;  %v773_v63 = vrot.slane %v771_v34, 5  ;;  %v777_v1 = vrot.slane %v775_v59, 4  ;;  %v2977_v50 = vld [vmem:[%s3232_s0 + $0xbc] sm:$0x1] }
  0x4b   :  { %v755_v22 = vrot.slane %v754_v60, 4  ;;  %v783_v0 = vrot.slane %v781_v33, 5  ;;  %v1265_v19 = vsel %vm2693_vm6, %v2014_v21, %v1264_v55  ;;  %v1266_v27 = vrot.slane %v1264_v55, 4  ;;  %v1149_v23 = vld [vmem:[%s3232_s0 + $0x78] sm:$0xe] }
  0x4c   :  { %v750_v2 = vsel %vm2462_vm3, %v745_v61, %v749_v12  ;;  %v768_v3 = vor.u32 %v767_v62, %v764_v56  ;;  %v778_v4 = vor.u32 %v777_v1, %v773_v63  ;;  %v1267_v17 = vrot.slane %v2653_v25, 5 }
  0x4d   :  { %v760_v26 = vsel %vm2462_vm3, %v755_v22, %v759_v49  ;;  %v2015_v18 = vrot.slane %v1148_v13, 9  ;;  %v1271_v20 = vrot.slane %v2662_v37, 5  ;;  %v2033_v36 = vcombine.low %v2890_v14, %v2900_v51 }
  0x4e   :  { %v1984_v29 = vcombine.low %v750_v2, %v760_v26  ;;  %v769_v52 = vrot.slane %v768_v3, 4  ;;  %v779_v32 = vrot.slane %v778_v4, 4  ;;  %v1268_v25 = vsel %vm2693_vm6, %v1266_v27, %v1267_v17  ;;  %v1150_v17 = vld [vmem:[%s3232_s0 + $0x84] sm:$0xe] }
  0x4f   :  { %2208 = vmatmul.mubr.msk.bf16.gmra.mrb[8].mxu0 %vm150_vm2, %v2031_v16  ;;  %v2034_v37 = vcombine.low %v1265_v19, %v1268_v25  ;;  %v1274_v47 = vrot.slane %v2677_v58, 5  ;;  %v786_v43 = vshrl.u32 %v440_v5, 16  ;;  %v789_v16 = vshll.u32 %v440_v5, 16  ;;  %v443_v58 = vld [vmem:[%s3232_s0 + $0xb4] sm:$0xf] }
  0x50   :  { %2211 = vmatprep.mubr.msk.bf16.mxu0 %vm150_vm2, %v2032_v35  ;;  %2187 = vmatprep.mubr.msk.bf16.mxu1 %vm150_vm2, %v1984_v29  ;;  %v774_v40 = vsel %vm2462_vm3, %v769_v52, %v773_v63  ;;  %v784_v45 = vsel %vm2462_vm3, %v779_v32, %v783_v0  ;;  %v795_v44 = vshll.u32 %v2940_v28, 16  ;;  %v1272_v14 = vsel %vm2693_vm6, %v2015_v18, %v1271_v20  ;;  %v1151_v32 = vld [vmem:[%s3232_s0 + $0x90] sm:$0xe] }
  0x51   :  { %v1985_v35 = vcombine.low %v774_v40, %v784_v45  ;;  %v788_v46 = vrot.slane %v786_v43, 4  ;;  %v799_v15 = vshrl.u32 %v2940_v28, 16  ;;  %v1273_v51 = vrot.slane %v1271_v20, 4 }
  0x52   :  { %v791_v53 = vrot.slane %v789_v16, 5  ;;  %v797_v54 = vrot.slane %v795_v44, 5  ;;  %v805_v42 = vshll.u32 %v2954_v39, 16  ;;  %v810_v48 = vshrl.u32 %v443_v58, 16 }
  0x53   :  { %2188 = vmatmul.mubr.msk.bf16.gmra.mrb[24].mxu1 %vm150_vm2, %v1985_v35  ;;  %v801_v12 = vrot.slane %v799_v15, 4  ;;  %v813_v49 = vshll.u32 %v443_v58, 16  ;;  %v819_v56 = vshll.u32 %v2969_v7, 16  ;;  %v823_v59 = vshrl.u32 %v2969_v7, 16 }
  0x54   :  { %v792_v57 = vor.u32 %v791_v53, %v788_v46  ;;  %v807_v34 = vrot.slane %v805_v42, 5  ;;  %v829_v60 = vshll.u32 %v2977_v50, 16  ;;  %v812_v21 = vrot.slane %v810_v48, 4  ;;  %v1152_v46 = vld [vmem:[%s3232_s0 + $0x9c] sm:$0xe] }
  0x55   :  { %v802_v33 = vor.u32 %v801_v12, %v797_v54  ;;  %v815_v55 = vrot.slane %v813_v49, 5  ;;  %v821_v61 = vrot.slane %v819_v56, 5  ;;  %v1275_v62 = vsel %vm2693_vm6, %v1273_v51, %v1274_v47  ;;  %v1153_v51 = vld [vmem:[%s3232_s0 + $0xa8] sm:$0xe] }
  0x56   :  { %v793_v63 = vrot.slane %v792_v57, 4  ;;  %v825_v1 = vrot.slane %v823_v59, 4  ;;  %v2016_v13 = vrot.slane %v1149_v23, 9  ;;  %v1278_v19 = vrot.slane %v2786_v6, 5 }
  0x57   :  { %2212 = vmatmul.mubr.msk.bf16.gmra.mrb[12].mxu0 %vm150_vm2, %v2033_v36  ;;  %v803_v22 = vrot.slane %v802_v33, 4  ;;  %v816_v0 = vor.u32 %v815_v55, %v812_v21  ;;  %v1281_v27 = vrot.slane %v2791_v10, 5  ;;  %v831_v4 = vrot.slane %v829_v60, 5 }
  0x58   :  { %2215 = vmatprep.mubr.msk.bf16.mxu0 %vm150_vm2, %v2034_v37  ;;  %v798_v2 = vsel %vm2462_vm3, %v793_v63, %v797_v54  ;;  %v826_v3 = vor.u32 %v825_v1, %v821_v61  ;;  %v1285_v5 = vrot.slane %v2812_v31, 5  ;;  %v1279_v6 = vsel %vm2693_vm6, %v2016_v13, %v1278_v19  ;;  %v1800_v63 = vld [vmem:[%s3233_s3] sm:$0xff] }
  0x59   :  { %v808_v26 = vsel %vm2462_vm3, %v803_v22, %v807_v34  ;;  %v817_v18 = vrot.slane %v816_v0, 4  ;;  %v1280_v10 = vrot.slane %v1278_v19, 4  ;;  %v2035_v20 = vcombine.low %v1272_v14, %v1275_v62 }
  0x5a   :  { %v1986_v29 = vcombine.low %v798_v2, %v808_v26  ;;  %v827_v52 = vrot.slane %v826_v3, 4  ;;  %v2017_v36 = vrot.slane %v1150_v17, 9  ;;  %v1287_v37 = vrot.slane %v1285_v5, 4 }
  0x5b   :  { %v822_v25 = vsel %vm2462_vm3, %v817_v18, %v821_v61  ;;  %v1282_v31 = vsel %vm2693_vm6, %v1280_v10, %v1281_v27  ;;  %v1288_v40 = vrot.slane %v2820_v38, 5  ;;  %v1292_v45 = vrot.slane %v2862_v11, 5  ;;  %v1803_v27 = vld [vmem:[%s3233_s3 + $0x18] sm:$0xff] }
  0x5c   :  { %2191 = vmatprep.mubr.msk.bf16.mxu1 %vm150_vm2, %v1986_v29  ;;  %v832_v47 = vsel %vm2462_vm3, %v827_v52, %v831_v4  ;;  %v2036_v43 = vcombine.low %v1279_v6, %v1282_v31  ;;  %v2018_v44 = vrot.slane %v1151_v32, 9  ;;  %v1295_v58 = vrot.slane %v2874_v41, 5 }
  0x5d   :  { %v1987_v16 = vcombine.low %v822_v25, %v832_v47  ;;  %v1294_v35 = vrot.slane %v1292_v45, 4  ;;  %v1286_v30 = vsel %vm2693_vm6, %v2017_v36, %v1285_v5  ;;  %v1289_v14 = vsel %vm2693_vm6, %v1287_v37, %v1288_v40  ;;  %v3094_v47 = vld [vmem:[%s3234_s2] ss:$0 sm:$0xff] }
  0x5e   :  { %v1299_v38 = vrot.slane %v2896_v8, 5  ;;  %v1293_v11 = vsel %vm2693_vm6, %v2018_v44, %v1292_v45  ;;  %v1306_v15 = vrot.slane %v2940_v28, 5  ;;  %v2037_v53 = vcombine.low %v1286_v30, %v1289_v14 }
  0x5f   :  { %2216 = vmatmul.mubr.msk.bf16.gmra.mrb[16].mxu0 %vm150_vm2, %v2035_v20  ;;  %2192 = vmatmul.mubr.msk.bf16.gmra.mrb[28].mxu1 %vm150_vm2, %v1987_v16  ;;  %v1296_v41 = vsel %vm2693_vm6, %v1294_v35, %v1295_v58  ;;  %v2019_v42 = vrot.slane %v1152_v46, 9  ;;  %v1302_v12 = vrot.slane %v2905_v24, 5  ;;  %v2020_v48 = vrot.slane %v1153_v51, 9 }
  0x60   :  { %2219 = vmatprep.mubr.msk.bf16.mxu0 %vm150_vm2, %v2036_v43  ;;  %v2038_v54 = vcombine.low %v1293_v11, %v1296_v41  ;;  %v1301_v8 = vrot.slane %v1299_v38, 4  ;;  %v1308_v49 = vrot.slane %v1306_v15, 4  ;;  %v1309_v56 = vrot.slane %v2954_v39, 5  ;;  %v1154_v39 = vld [vmem:[%s3232_s0 + $0xb4] sm:$0xe] }
  0x61   :  { %v1300_v28 = vsel %vm2693_vm6, %v2019_v42, %v1299_v38  ;;  %v1313_v57 = vrot.slane %v2969_v7, 5  ;;  %v1307_v34 = vsel %vm2693_vm6, %v2020_v48, %v1306_v15  ;;  %v2021_v33 = vrot.slane %v1154_v39, 9 }
  0x62   :  { %v1303_v23 = vsel %vm2693_vm6, %v1301_v8, %v1302_v12  ;;  %v1310_v24 = vsel %vm2693_vm6, %v1308_v49, %v1309_v56  ;;  %v1316_v55 = vrot.slane %v2977_v50, 5  ;;  %v1801_v50 = vld [vmem:[%s3233_s3 + $0x8] sm:$0xff]  ;;  %v2246_v2 = vpack.c.bf16 %v1803_v27, %v1802_v9 }
  0x63   :  { %v2039_v59 = vcombine.low %v1300_v28, %v1303_v23  ;;  %v2040_v60 = vcombine.low %v1307_v34, %v1310_v24  ;;  %v1315_v21 = vrot.slane %v1313_v57, 4  ;;  %v1314_v7 = vsel %vm2693_vm6, %v2021_v33, %v1313_v57 }
  0x64   :  { %v2242_v13 = vpack.c.bf16 %v1801_v50, %v1800_v63  ;;  %vm1837_vm12 = vcmask 1046534   ;;  %vm1839_vm13 = vcmask 1047559  }
  0x65   :  { %v1317_v61 = vsel %vm2693_vm6, %v1315_v21, %v1316_v55 }
  0x66   :  { %v2041_v62 = vcombine.low %v1314_v7, %v1317_v61  ;;  %2243 = vmatprep.subr.bf16.mxu1 %v2242_v13 }
  0x67   :  { %2220 = vmatmul.mubr.msk.bf16.gmra.mrb[20].mxu0 %vm150_vm2, %v2037_v53  ;;  %2245 = vmatpush3.bf16.msra.mxu1 %v2242_v13 }
  0x68   :  { %2223 = vmatprep.mubr.msk.bf16.mxu0 %vm150_vm2, %v2038_v54  ;;  %2247 = vmatprep.subr.bf16.mxu1 %v2246_v2 }
  0x6b   :  { %2249 = vmatpush3.bf16.msra.mxu1 %v2246_v2 }
  0x6f   :  { %2224 = vmatmul.mubr.msk.bf16.gmra.mrb[24].mxu0 %vm150_vm2, %v2039_v59 }
  0x70   :  { %2227 = vmatprep.mubr.msk.bf16.mxu0 %vm150_vm2, %v2040_v60 }
  0x77   :  { %2228 = vmatmul.mubr.msk.bf16.gmra.mrb[28].mxu0 %vm150_vm2, %v2041_v62 }
  0xdd   :  { %v2129_v1 = vpop.f32.mrb[0].mxu1 }
  0xde   :  { %v233_v22 = vpop.f32.mrb[1].mxu1  ;;  %v368_v43 = vadd.f32 %v2129_v1, %v3094_v47 }
  0xdf   :  { %v2130_v0 = vpop.f32.mrb[2].mxu1  ;;  %v366_v40 = vadd.f32 %v3094_v47, %v233_v22 }
  0xe0   :  { %v236_v19 = vpop.f32.mrb[3].mxu1  ;;  %v369_v16 = vadd.f32 %v2130_v0, %v3094_v47 }
  0xe1   :  { %v367_v35 = vadd.f32 %v3094_v47, %v236_v19 }
  0xe5   :  { %v2133_v3 = vpop.f32.mrb[4].mxu1 }
  0xe6   :  { %v249_v4 = vpop.f32.mrb[5].mxu1  ;;  %v372_v54 = vadd.f32 %v2133_v3, %v3094_v47 }
  0xe7   :  { %v2134_v17 = vpop.f32.mrb[6].mxu1  ;;  %v370_v12 = vadd.f32 %v3094_v47, %v249_v4 }
  0xe8   :  { %v252_v5 = vpop.f32.mrb[7].mxu1  ;;  %v373_v23 = vadd.f32 %v2134_v17, %v3094_v47 }
  0xe9   :  { %v371_v59 = vadd.f32 %v3094_v47, %v252_v5 }
  0xed   :  { %v2137_v26 = vpop.f32.mrb[8].mxu1 }
  0xee   :  { %v265_v18 = vpop.f32.mrb[9].mxu1  ;;  %v376_v27 = vadd.f32 %v2137_v26, %v3094_v47 }
  0xef   :  { %v3071_v6 = vpop.f32.mrb[10].mxu1  ;;  %v374_v4 = vadd.f32 %v3094_v47, %v265_v18 }
  0xf0   :  { %v3073_v10 = vpop.f32.mrb[11].mxu1  ;;  %v377_v26 = vadd.f32 %v3071_v6, %v3094_v47 }
  0xf1   :  { %v375_v18 = vadd.f32 %v3094_v47, %v3073_v10 }
  0xf5   :  { %v3075_v20 = vpop.f32.mrb[12].mxu1 }
  0xf6   :  { %v3077_v29 = vpop.f32.mrb[13].mxu1 }
  0xf7   :  { %v3079_v52 = vpop.f32.mrb[14].mxu1 }
  0xf8   :  { %v3081_v32 = vpop.f32.mrb[15].mxu1 }
  0xfd   :  { %v3083_v25 = vpop.f32.mrb[16].mxu1 }
  0xfe   :  { %v3085_v31 = vpop.f32.mrb[17].mxu1 }
  0xff   :  { %v3087_v36 = vpop.f32.mrb[18].mxu1 }
 0x100   :  { %v3089_v37 = vpop.f32.mrb[19].mxu1 }
 0x112   :  { %v2201_v45 = vpop.f32.mrb[0].mxu0 }
 0x113   :  { %v2255_v44 = vadd.f32 %v2201_v45, %v368_v43  ;;  %v1465_v58 = vpop.f32.mrb[1].mxu0 }
 0x114   :  { %v2257_v30 = vadd.f32 %v1465_v58, %v366_v40  ;;  %v2202_v14 = vpop.f32.mrb[2].mxu0 }
 0x115   :  { %v1626_v38 = vmax.f32 %v2255_v44, 0.0  ;;  %v2259_v11 = vadd.f32 %v2202_v14, %v369_v16  ;;  %v1468_v41 = vpop.f32.mrb[3].mxu0 }
 0x116   :  { %v1624_v46 = vmax.f32 %v2257_v30, 0.0  ;;  %v2261_v15 = vadd.f32 %v1468_v41, %v367_v35 }
 0x117   :  { %v1627_v51 = vmax.f32 %v2259_v11, 0.0  ;;  %v1665_v42 = vsel %vm150_vm2, %v1626_v38, -inf }
 0x118   :  { %v1625_v53 = vmax.f32 %v2261_v15, 0.0  ;;  %v1656_v48 = vsel %vm150_vm2, %v1624_v46, -inf }
 0x119   :  { %v1666_v8 = vsel %vm150_vm2, %v1627_v51, -inf }
 0x11a   :  { %v1667_v49 = vmax.f32 %v1665_v42, %v1666_v8  ;;  %v1657_v56 = vsel %vm150_vm2, %v1625_v53, -inf  ;;  %v2205_v28 = vpop.f32.mrb[4].mxu0 }
 0x11b   :  { %v1658_v57 = vmax.f32 %v1656_v48, %v1657_v56  ;;  %v2263_v34 = vadd.f32 %v2205_v28, %v372_v54  ;;  %v1481_v24 = vpop.f32.mrb[5].mxu0 }
 0x11c   :  { %v1668_v60 = vrot.slane %v1667_v49, 4  ;;  %v2265_v33 = vadd.f32 %v1481_v24, %v370_v12  ;;  %v2206_v21 = vpop.f32.mrb[6].mxu0  ;;  %v378_v24 = vadd.f32 %v3094_v47, %v3077_v29 }
 0x11d   :  { %v3107_v39 = vpop.f32.mrb[20].mxu1  ;;  %v1659_v7 = vrot.slane %v1658_v57, 4  ;;  %v1630_v61 = vmax.f32 %v2263_v34, 0.0  ;;  %v2267_v62 = vadd.f32 %v2206_v21, %v373_v23  ;;  %v1484_v63 = vpop.f32.mrb[7].mxu0  ;;  %v380_v34 = vadd.f32 %v3075_v20, %v3094_v47 }
 0x11e   :  { %v3110_v55 = vpop.f32.mrb[21].mxu1  ;;  %v1669_v1 = vmax.f32 %v1667_v49, %v1668_v60  ;;  %v1628_v13 = vmax.f32 %v2265_v33, 0.0  ;;  %v2269_v22 = vadd.f32 %v1484_v63, %v371_v59 }
 0x11f   :  { %v3112_v50 = vpop.f32.mrb[22].mxu1  ;;  %v1660_v19 = vmax.f32 %v1658_v57, %v1659_v7  ;;  %v1631_v9 = vmax.f32 %v2267_v62, 0.0  ;;  %v1683_v5 = vsel %vm150_vm2, %v1630_v61, -inf }
 0x120   :  { %v3114_v0 = vpop.f32.mrb[23].mxu1  ;;  %v1670_v2 = vrot.slane %v1669_v1, 2  ;;  %v1629_v3 = vmax.f32 %v2269_v22, 0.0  ;;  %v1674_v45 = vsel %vm150_vm2, %v1628_v13, -inf }
 0x121   :  { %v1661_v17 = vrot.slane %v1660_v19, 2  ;;  %v1684_v43 = vsel %vm150_vm2, %v1631_v9, -inf }
 0x122   :  { %v1671_v40 = vmax.f32 %v1669_v1, %v1670_v2  ;;  %v1685_v16 = vmax.f32 %v1683_v5, %v1684_v43  ;;  %v1675_v44 = vsel %vm150_vm2, %v1629_v3, -inf  ;;  %v2209_v58 = vpop.f32.mrb[8].mxu0 }
 0x123   :  { %v1662_v35 = vmax.f32 %v1660_v19, %v1661_v17  ;;  %v1676_v30 = vmax.f32 %v1674_v45, %v1675_v44  ;;  %v2271_v14 = vadd.f32 %v2209_v58, %v376_v27  ;;  %v1497_v38 = vpop.f32.mrb[9].mxu0  ;;  %v381_v19 = vadd.f32 %v3079_v52, %v3094_v47 }
 0x124   :  { %v1672_v11 = vrot.slane %v1671_v40, 1  ;;  %v1686_v41 = vrot.slane %v1685_v16, 4  ;;  %v2273_v46 = vadd.f32 %v1497_v38, %v374_v4  ;;  %v2210_v15 = vpop.f32.mrb[10].mxu0  ;;  %v379_v4 = vadd.f32 %v3094_v47, %v3081_v32 }
 0x125   :  { %v1663_v51 = vrot.slane %v1662_v35, 1  ;;  %v1677_v53 = vrot.slane %v1676_v30, 4  ;;  %v1634_v54 = vmax.f32 %v2271_v14, 0.0  ;;  %v2275_v42 = vadd.f32 %v2210_v15, %v377_v26  ;;  %v1500_v8 = vpop.f32.mrb[11].mxu0 }
 0x126   :  { %v1673_v12 = vmax.f32 %v1671_v40, %v1672_v11  ;;  %v1687_v48 = vmax.f32 %v1685_v16, %v1686_v41  ;;  %v1632_v6 = vmax.f32 %v2273_v46, 0.0  ;;  %v2277_v49 = vadd.f32 %v1500_v8, %v375_v18  ;;  %v3126_v56 = vpop.f32.mrb[24].mxu1 }
 0x127   :  { %v1664_v28 = vmax.f32 %v1662_v35, %v1663_v51  ;;  %v1678_v23 = vmax.f32 %v1676_v30, %v1677_v53  ;;  %v1635_v57 = vmax.f32 %v2275_v42, 0.0  ;;  %v3128_v10 = vpop.f32.mrb[25].mxu1  ;;  %v1701_v61 = vsel %vm150_vm2, %v1634_v54, -inf }
 0x128   :  { %v1688_v59 = vrot.slane %v1687_v48, 2  ;;  %v1633_v60 = vmax.f32 %v2277_v49, 0.0  ;;  %v3134_v33 = vpop.f32.mrb[26].mxu1  ;;  %v1692_v13 = vsel %vm150_vm2, %v1632_v6, -inf  ;;  %v384_v35 = vadd.f32 %v3083_v25, %v3094_v47 }
 0x129   :  { %v1828_v21 = vsel %vm1827_vm7, %v1673_v12, %v1664_v28  ;;  %v1679_v7 = vrot.slane %v1678_v23, 2  ;;  %v1702_v62 = vsel %vm150_vm2, %v1635_v57, -inf  ;;  %v3139_v63 = vpop.f32.mrb[27].mxu1  ;;  %v382_v38 = vadd.f32 %v3094_v47, %v3085_v31 }
 0x12a   :  { %v1689_v1 = vmax.f32 %v1687_v48, %v1688_v59  ;;  %v1703_v20 = vmax.f32 %v1701_v61, %v1702_v62  ;;  %v1693_v22 = vsel %vm150_vm2, %v1633_v60, -inf  ;;  %v2213_v29 = vpop.f32.mrb[12].mxu0  ;;  %v385_v28 = vadd.f32 %v3087_v36, %v3094_v47 }
 0x12b   :  { %v1680_v9 = vmax.f32 %v1678_v23, %v1679_v7  ;;  %v1694_v27 = vmax.f32 %v1692_v13, %v1693_v22  ;;  %v2279_v2 = vadd.f32 %v2213_v29, %v380_v34  ;;  %v1513_v3 = vpop.f32.mrb[13].mxu0  ;;  %v383_v60 = vadd.f32 %v3094_v47, %v3089_v37 }
 0x12c   :  { %v1690_v17 = vrot.slane %v1689_v1, 1  ;;  %v1704_v5 = vrot.slane %v1703_v20, 4  ;;  %v2281_v43 = vadd.f32 %v1513_v3, %v378_v24  ;;  %v2214_v40 = vpop.f32.mrb[14].mxu0 }
 0x12d   :  { %v1681_v45 = vrot.slane %v1680_v9, 1  ;;  %v1695_v16 = vrot.slane %v1694_v27, 4  ;;  %v1638_v44 = vmax.f32 %v2279_v2, 0.0  ;;  %v2283_v58 = vadd.f32 %v2214_v40, %v381_v19  ;;  %v1516_v26 = vpop.f32.mrb[15].mxu0 }
 0x12e   :  { %v1705_v52 = vmax.f32 %v1703_v20, %v1704_v5  ;;  %v1636_v30 = vmax.f32 %v2281_v43, 0.0  ;;  %v2285_v14 = vadd.f32 %v1516_v26, %v379_v4  ;;  %v1691_v41 = vmax.f32 %v1689_v1, %v1690_v17 }
 0x12f   :  { %v1682_v32 = vmax.f32 %v1680_v9, %v1681_v45  ;;  %v1696_v18 = vmax.f32 %v1694_v27, %v1695_v16  ;;  %v1639_v11 = vmax.f32 %v2283_v58, 0.0  ;;  %v1719_v15 = vsel %vm150_vm2, %v1638_v44, -inf }
 0x130   :  { %v1706_v46 = vrot.slane %v1705_v52, 2  ;;  %v1637_v51 = vmax.f32 %v2285_v14, 0.0  ;;  %v1710_v25 = vsel %vm150_vm2, %v1636_v30, -inf  ;;  %v2294_v9 = vadd.f32 %v3107_v39, %v3094_v47 }
 0x131   :  { %v1830_v53 = vsel %vm1829_vm8, %v1682_v32, %v1828_v21  ;;  %v1697_v54 = vrot.slane %v1696_v18, 2  ;;  %v1720_v42 = vsel %vm150_vm2, %v1639_v11, -inf  ;;  %v2296_v4 = vadd.f32 %v3094_v47, %v3110_v55 }
 0x132   :  { %v1707_v8 = vmax.f32 %v1705_v52, %v1706_v46  ;;  %v1721_v12 = vmax.f32 %v1719_v15, %v1720_v42  ;;  %v1711_v31 = vsel %vm150_vm2, %v1637_v51, -inf  ;;  %v2217_v48 = vpop.f32.mrb[16].mxu0  ;;  %v3156_v6 = vpop.f32.mrb[28].mxu1  ;;  %v1832_v49 = vsel %vm1831_vm9, %v1691_v41, %v1830_v53 }
 0x133   :  { %v1698_v23 = vmax.f32 %v1696_v18, %v1697_v54  ;;  %v1712_v57 = vmax.f32 %v1710_v25, %v1711_v31  ;;  %v2287_v34 = vadd.f32 %v2217_v48, %v384_v35  ;;  %v1529_v24 = vpop.f32.mrb[17].mxu0  ;;  %v3161_v59 = vpop.f32.mrb[29].mxu1  ;;  %v2300_v46 = vadd.f32 %v3094_v47, %v3114_v0 }
 0x134   :  { %v1708_v21 = vrot.slane %v1707_v8, 1  ;;  %v1722_v7 = vrot.slane %v1721_v12, 4  ;;  %v2289_v61 = vadd.f32 %v1529_v24, %v382_v38  ;;  %v2218_v62 = vpop.f32.mrb[18].mxu0  ;;  %v3165_v1 = vpop.f32.mrb[30].mxu1  ;;  %v2298_v38 = vadd.f32 %v3112_v50, %v3094_v47 }
 0x135   :  { %v1699_v13 = vrot.slane %v1698_v23, 1  ;;  %v1713_v20 = vrot.slane %v1712_v57, 4  ;;  %v1642_v22 = vmax.f32 %v2287_v34, 0.0  ;;  %v2291_v29 = vadd.f32 %v2218_v62, %v385_v28  ;;  %v1532_v36 = vpop.f32.mrb[19].mxu0  ;;  %v3167_v19 = vpop.f32.mrb[31].mxu1 }
 0x136   :  { %v1723_v27 = vmax.f32 %v1721_v12, %v1722_v7  ;;  %v1640_v2 = vmax.f32 %v2289_v61, 0.0  ;;  %v2293_v3 = vadd.f32 %v1532_v36, %v383_v60  ;;  %v1709_v43 = vmax.f32 %v1707_v8, %v1708_v21 }
 0x137   :  { %v1700_v37 = vmax.f32 %v1698_v23, %v1699_v13  ;;  %v1714_v17 = vmax.f32 %v1712_v57, %v1713_v20  ;;  %v1643_v5 = vmax.f32 %v2291_v29, 0.0  ;;  %v1737_v45 = vsel %vm150_vm2, %v1642_v22, -inf }
 0x138   :  { %v1724_v40 = vrot.slane %v1723_v27, 2  ;;  %v1641_v16 = vmax.f32 %v2293_v3, 0.0  ;;  %v1728_v58 = vsel %vm150_vm2, %v1640_v2, -inf  ;;  %v2302_v48 = vadd.f32 %v3126_v56, %v3094_v47 }
 0x139   :  { %v1715_v44 = vrot.slane %v1714_v17, 2  ;;  %v1738_v39 = vsel %vm150_vm2, %v1643_v5, -inf  ;;  %v1834_v26 = vsel %vm1833_vm10, %v1700_v37, %v1832_v49  ;;  %v2304_v57 = vadd.f32 %v3094_v47, %v3128_v10 }
 0x13a   :  { %v1725_v35 = vmax.f32 %v1723_v27, %v1724_v40  ;;  %v1739_v52 = vmax.f32 %v1737_v45, %v1738_v39  ;;  %v1729_v30 = vsel %vm150_vm2, %v1641_v16, -inf  ;;  %v2221_v55 = vpop.f32.mrb[20].mxu0  ;;  %v1836_v14 = vsel %vm1835_vm11, %v1709_v43, %v1834_v26 }
 0x13b   :  { %v1716_v32 = vmax.f32 %v1714_v17, %v1715_v44  ;;  %v1730_v18 = vmax.f32 %v1728_v58, %v1729_v30  ;;  %v2295_v11 = vadd.f32 %v2294_v9, %v2221_v55  ;;  %v1545_v41 = vpop.f32.mrb[21].mxu0  ;;  %v2306_v9 = vadd.f32 %v3134_v33, %v3094_v47 }
 0x13c   :  { %v1740_v15 = vrot.slane %v1739_v52, 4  ;;  %v2297_v51 = vadd.f32 %v2296_v4, %v1545_v41  ;;  %v2222_v53 = vpop.f32.mrb[22].mxu0  ;;  %v1726_v54 = vrot.slane %v1725_v35, 1  ;;  %v2308_v4 = vadd.f32 %v3094_v47, %v3139_v63 }
 0x13d   :  { %v1717_v25 = vrot.slane %v1716_v32, 1  ;;  %v1731_v42 = vrot.slane %v1730_v18, 4  ;;  %v1646_v8 = vmax.f32 %v2295_v11, 0.0  ;;  %v2299_v12 = vadd.f32 %v2298_v38, %v2222_v53  ;;  %v1548_v31 = vpop.f32.mrb[23].mxu0 }
 0x13e   :  { %v1741_v50 = vmax.f32 %v1739_v52, %v1740_v15  ;;  %v1644_v49 = vmax.f32 %v2297_v51, 0.0  ;;  %v2301_v28 = vadd.f32 %v2300_v46, %v1548_v31  ;;  %v1727_v7 = vmax.f32 %v1725_v35, %v1726_v54 }
 0x13f   :  { %v1718_v23 = vmax.f32 %v1716_v32, %v1717_v25  ;;  %v1732_v0 = vmax.f32 %v1730_v18, %v1731_v42  ;;  %v1647_v34 = vmax.f32 %v2299_v12, 0.0  ;;  %v1755_v60 = vsel %vm150_vm2, %v1646_v8, -inf }
 0x140   :  { %v1742_v24 = vrot.slane %v1741_v50, 2  ;;  %v1645_v21 = vmax.f32 %v2301_v28, 0.0  ;;  %v1746_v62 = vsel %vm150_vm2, %v1644_v49, -inf  ;;  %v2310_v38 = vadd.f32 %v3156_v6, %v3094_v47 }
 0x141   :  { %v1733_v61 = vrot.slane %v1732_v0, 2  ;;  %v1756_v13 = vsel %vm150_vm2, %v1647_v34, -inf  ;;  %v1838_v56 = vsel %vm1837_vm12, %v1718_v23, %v1836_v14  ;;  %v2312_v63 = vadd.f32 %v3094_v47, %v3161_v59 }
 0x142   :  { %v1743_v20 = vmax.f32 %v1741_v50, %v1742_v24  ;;  %v1757_v22 = vmax.f32 %v1755_v60, %v1756_v13  ;;  %v1747_v29 = vsel %vm150_vm2, %v1645_v21, -inf  ;;  %v2225_v36 = vpop.f32.mrb[24].mxu0  ;;  %v1840_v10 = vsel %vm1839_vm13, %v1727_v7, %v1838_v56 }
 0x143   :  { %v1734_v27 = vmax.f32 %v1732_v0, %v1733_v61  ;;  %v1748_v2 = vmax.f32 %v1746_v62, %v1747_v29  ;;  %v2303_v3 = vadd.f32 %v2302_v48, %v2225_v36  ;;  %v1561_v37 = vpop.f32.mrb[25].mxu0  ;;  %2239 = vmatprep.mubr.msk.f32.mxu1 %vm150_vm2, %v1840_v10  ;;  %v2314_v6 = vadd.f32 %v3165_v1, %v3094_v47 }
 0x144   :  { %v1744_v17 = vrot.slane %v1743_v20, 1  ;;  %v1758_v5 = vrot.slane %v1757_v22, 4  ;;  %v2305_v43 = vadd.f32 %v2304_v57, %v1561_v37  ;;  %v2226_v40 = vpop.f32.mrb[26].mxu0  ;;  %v2316_v48 = vadd.f32 %v3094_v47, %v3167_v19 }
 0x145   :  { %v1735_v45 = vrot.slane %v1734_v27, 1  ;;  %v1749_v16 = vrot.slane %v1748_v2, 4  ;;  %v1650_v44 = vmax.f32 %v2303_v3, 0.0  ;;  %v2307_v58 = vadd.f32 %v2306_v9, %v2226_v40  ;;  %v1564_v39 = vpop.f32.mrb[27].mxu0 }
 0x146   :  { %v1745_v26 = vmax.f32 %v1743_v20, %v1744_v17  ;;  %v1759_v33 = vmax.f32 %v1757_v22, %v1758_v5  ;;  %v1648_v35 = vmax.f32 %v2305_v43, 0.0  ;;  %v2309_v52 = vadd.f32 %v2308_v4, %v1564_v39 }
 0x147   :  { %v1736_v30 = vmax.f32 %v1734_v27, %v1735_v45  ;;  %v1750_v55 = vmax.f32 %v1748_v2, %v1749_v16  ;;  %v1651_v14 = vmax.f32 %v2307_v58, 0.0  ;;  %v1773_v46 = vsel %vm150_vm2, %v1650_v44, -inf }
 0x148   :  { %v1760_v32 = vrot.slane %v1759_v33, 2  ;;  %v1649_v18 = vmax.f32 %v2309_v52, 0.0  ;;  %v1764_v53 = vsel %vm150_vm2, %v1648_v35, -inf }
 0x149   :  { %v1841_v11 = vsel %vm1827_vm7, %v1745_v26, %v1736_v30  ;;  %v1751_v41 = vrot.slane %v1750_v55, 2  ;;  %v1774_v15 = vsel %vm150_vm2, %v1651_v14, -inf }
 0x14a   :  { %v1761_v51 = vmax.f32 %v1759_v33, %v1760_v32  ;;  %v1775_v54 = vmax.f32 %v1773_v46, %v1774_v15  ;;  %v1765_v25 = vsel %vm150_vm2, %v1649_v18, -inf  ;;  %v2229_v42 = vpop.f32.mrb[28].mxu0 }
 0x14b   :  { %v1752_v59 = vmax.f32 %v1750_v55, %v1751_v41  ;;  %v1766_v8 = vmax.f32 %v1764_v53, %v1765_v25  ;;  %v2311_v12 = vadd.f32 %v2310_v38, %v2229_v42  ;;  %v1577_v31 = vpop.f32.mrb[29].mxu0 }
 0x14c   :  { %v1762_v50 = vrot.slane %v1761_v51, 1  ;;  %v1776_v49 = vrot.slane %v1775_v54, 4  ;;  %v2313_v28 = vadd.f32 %v2312_v63, %v1577_v31  ;;  %v2230_v23 = vpop.f32.mrb[30].mxu0 }
 0x14d   :  { %v1753_v57 = vrot.slane %v1752_v59, 1  ;;  %v1767_v0 = vrot.slane %v1766_v8, 4  ;;  %v1654_v34 = vmax.f32 %v2311_v12, 0.0  ;;  %v2315_v24 = vadd.f32 %v2314_v6, %v2230_v23  ;;  %v1580_v60 = vpop.f32.mrb[31].mxu0 }
 0x14e   :  { %v1777_v21 = vmax.f32 %v1775_v54, %v1776_v49  ;;  %v1652_v7 = vmax.f32 %v2313_v28, 0.0  ;;  %v2317_v61 = vadd.f32 %v2316_v48, %v1580_v60  ;;  %v1763_v56 = vmax.f32 %v1761_v51, %v1762_v50 }
 0x14f   :  { %v1754_v1 = vmax.f32 %v1752_v59, %v1753_v57  ;;  %v1768_v62 = vmax.f32 %v1766_v8, %v1767_v0  ;;  %v1655_v13 = vmax.f32 %v2315_v24, 0.0  ;;  %v1791_v22 = vsel %vm150_vm2, %v1654_v34, -inf }
 0x150   :  { %v1778_v20 = vrot.slane %v1777_v21, 2  ;;  %v1653_v47 = vmax.f32 %v2317_v61, 0.0  ;;  %v1782_v36 = vsel %vm150_vm2, %v1652_v7, -inf }
 0x151   :  { %v1842_v19 = vsel %vm1829_vm8, %v1754_v1, %v1841_v11  ;;  %v1769_v29 = vrot.slane %v1768_v62, 2  ;;  %v1792_v10 = vsel %vm150_vm2, %v1655_v13, -inf  ;;  %v2060_v11 = vld [vmem:[%s3235_s4] ss:$0 sm:$0xff] }
 0x152   :  { %v1779_v9 = vmax.f32 %v1777_v21, %v1778_v20  ;;  %v1843_v27 = vsel %vm1831_vm9, %v1763_v56, %v1842_v19  ;;  %v1793_v2 = vmax.f32 %v1791_v22, %v1792_v10  ;;  %v1783_v3 = vsel %vm150_vm2, %v1653_v47, -inf }
 0x153   :  { %v1770_v37 = vmax.f32 %v1768_v62, %v1769_v29  ;;  %v1784_v4 = vmax.f32 %v1782_v36, %v1783_v3 }
 0x154   :  { %v1780_v17 = vrot.slane %v1779_v9, 1  ;;  %v1794_v5 = vrot.slane %v1793_v2, 4 }
 0x155   :  { %v1771_v43 = vrot.slane %v1770_v37, 1  ;;  %v1785_v40 = vrot.slane %v1784_v4, 4 }
 0x156   :  { %v1795_v45 = vmax.f32 %v1793_v2, %v1794_v5  ;;  %v1781_v58 = vmax.f32 %v1779_v9, %v1780_v17 }
 0x157   :  { %v1772_v16 = vmax.f32 %v1770_v37, %v1771_v43  ;;  %v1786_v44 = vmax.f32 %v1784_v4, %v1785_v40 }
 0x158   :  { %v1796_v39 = vrot.slane %v1795_v45, 2 }
 0x159   :  { %v1844_v26 = vsel %vm1833_vm10, %v1772_v16, %v1843_v27  ;;  %v1787_v33 = vrot.slane %v1786_v44, 2 }
 0x15a   :  { %v1797_v35 = vmax.f32 %v1795_v45, %v1796_v39  ;;  %v1845_v52 = vsel %vm1835_vm11, %v1781_v58, %v1844_v26 }
 0x15b   :  { %v1788_v30 = vmax.f32 %v1786_v44, %v1787_v33 }
 0x15c   :  { %v1798_v55 = vrot.slane %v1797_v35, 1 }
 0x15d   :  { %v1789_v14 = vrot.slane %v1788_v30, 1 }
 0x15e   :  { %v1799_v63 = vmax.f32 %v1797_v35, %v1798_v55 }
 0x15f   :  { %v1790_v38 = vmax.f32 %v1788_v30, %v1789_v14 }
 0x161   :  { %v1846_v32 = vsel %vm1837_vm12, %v1790_v38, %v1845_v52 }
 0x162   :  { %v1847_v18 = vsel %vm1839_vm13, %v1799_v63, %v1846_v32 }
 0x163   :  { %2240 = vmatmul.mubr.msk.f32.vlgmr.msra.gmra.mrb[32].mxu1 %vm150_vm2, %v1847_v18 }
 0x236   :  { %v2241_v41 = vpop.f32.mrb[32].mxu1 }
 0x237   :  { %v1924_v46 = vadd.f32 %v2241_v41, %v2060_v11  ;;  %v1918_v15 = vpop.f32.mrb[33].mxu1 }
 0x238   :  { %v1919_v51 = vadd.f32 %v2060_v11, %v1918_v15 }
 0x239   :  { %1928 = vst [vmem:[%s3236_s5 + $0x8] sm:$0xff] %v1924_v46 }
 0x23a   :  { %1927 = vst [vmem:[%s3236_s5] sm:$0xff] %v1919_v51 }

</bundles_post_ra>
